<compile_context>
chip_gen: v5e
topology: v5e:2x2
jax: 0.10.0
libtpu: 0.0.40
codegen_flags: <defaults>
</compile_context>

<pallas_src>
import jax
import jax.numpy as jnp
from jax.experimental import pallas as pl
from jax.experimental.pallas import tpu as pltpu

_LN2 = 0.6931471805599453
_BIG = 1e18  # above this ax*ax would overflow f32; asinh(x) ~= log(2|x|) there


def _asinh_kernel(x_ref, o_ref):
    xf = x_ref[...].astype(jnp.float32)
    ax = jnp.abs(xf)
    big = ax > jnp.float32(_BIG)
    # Stable formulation (exact rearrangement, accurate for tiny |x|):
    #   asinh(a) = log1p(a + a^2 / (1 + sqrt(a^2 + 1)))          for a <= BIG
    #   asinh(a) = log(2a) = log1p(a) + ln2  (a huge)            for a  > BIG
    # Select BEFORE the log so the Inf/NaN from a^2 overflow on the huge
    # branch never reaches the selected lane.
    sq = ax * ax
    t = ax + sq / (jnp.float32(1.0) + jnp.sqrt(sq + jnp.float32(1.0)))
    arg = jnp.where(big, ax, t)
    y = jnp.log1p(arg) + jnp.where(big, jnp.float32(_LN2), jnp.float32(0.0))
    # Preserve the sign bit (torch.asinh(-0.0) == -0.0).
    o_ref[...] = jnp.where(jnp.signbit(xf), -y, y).astype(o_ref.dtype)


def _choose_layout(total, itemsize):
    """Pick a lane-dense (rows, lane) view and a row-tile size."""
    # Sublane packing for the dtype (f32: 8, bf16: 16, int8/fp8: 32).
    pack = 8 * max(1, 4 // itemsize)

    # Prefer a lane width that divides total so no pad/slice copy is needed.
    lane = None
    for cand in (1024, 512, 256, 128):
        if total % cand == 0:
            lane = cand
            break
    if lane is None:
        lane = 1024 if total >= 8 * 1024 else 128
    rows = pl.cdiv(total, lane)
    padded = rows * lane

    # ~4 MiB per pipeline buffer (2x in + 2x out double buffers = ~16 MiB),
    # rounded to the sublane packing. Larger tiles amortize the ~0.35us/step
    # grid overhead; fits every generation's scoped-VMEM budget.
    cap_rows = max(pack, ((4 << 20) // (lane * itemsize)) // pack * pack)
    tile_rows = rows if rows <= cap_rows else cap_rows
    return lane, rows, tile_rows, padded


def asinh_pallas(x):
    """Elementwise asinh, matching torch.asinh(x) semantics (same shape/dtype)."""
    orig_shape = x.shape
    orig_dtype = x.dtype
    total = int(x.size)
    if total == 0:
        return x
    itemsize = jnp.dtype(orig_dtype).itemsize

    lane, rows, tile_rows, padded = _choose_layout(total, itemsize)

    flat = x.reshape(-1)
    if padded != total:
        # Fallback path only when no candidate lane width divides the size.
        flat = jnp.pad(flat, (0, padded - total))
    x2d = flat.reshape(rows, lane)

    grid = (pl.cdiv(rows, tile_rows),)

    cost = pl.CostEstimate(
        flops=8 * total,
        transcendentals=2 * total,  # 1 sqrt + 1 log1p per element
        bytes_accessed=2 * total * itemsize,
    )

    out2d = pl.pallas_call(
        _asinh_kernel,
        out_shape=jax.ShapeDtypeStruct((rows, lane), orig_dtype),
        grid_spec=pl.GridSpec(
            grid=grid,
            in_specs=[pl.BlockSpec((tile_rows, lane), lambda i: (i, 0))],
            out_specs=pl.BlockSpec((tile_rows, lane), lambda i: (i, 0)),
        ),
        compiler_params=pltpu.CompilerParams(
            dimension_semantics=("parallel",),
            vmem_limit_bytes=32 << 20,
        ),
        cost_estimate=cost,
    )(x2d)

    out_flat = out2d.reshape(-1)
    if padded != total:
        out_flat = out_flat[:total]
    return out_flat.reshape(orig_shape)


if __name__ == "__main__":
    key = jax.random.PRNGKey(0)
    # NCHW-style input, consistent with the torch module's typical usage.
    x = jax.random.normal(key, (2, 4, 16, 16), dtype=jnp.float32) * 3.0

    y = asinh_pallas(x)
    jax.block_until_ready(y)

    # Reference check against jnp.arcsinh (same math as torch.asinh).
    y_ref = jnp.arcsinh(x)
    assert y.shape == x.shape and y.dtype == x.dtype
    assert jnp.allclose(y, y_ref, atol=1e-6, rtol=1e-5), "mismatch vs reference"

    # Sign-of-zero, tiny-|x| (log1p path), and large-magnitude branches.
    extreme = jnp.array(
        [-0.0, 0.0, 1e-7, -1e-7, 1e-3, 3e19, -3e19, 1e30], dtype=jnp.float32
    )
    y_ext = asinh_pallas(extreme)
    assert jnp.allclose(y_ext, jnp.arcsinh(extreme), rtol=1e-5, atol=0.0), (
        "extreme mismatch"
    )

    # Non-divisible size exercises the (rare) padded fallback path.
    x_odd = jax.random.normal(jax.random.PRNGKey(1), (1000,), dtype=jnp.float32)
    y_odd = asinh_pallas(x_odd)
    assert jnp.allclose(y_odd, jnp.arcsinh(x_odd), atol=1e-6, rtol=1e-5), (
        "odd-size mismatch"
    )

    print("KERNEL_OK")
</pallas_src>

<mosaic_0001>
module attributes {stable_mosaic.version = 11 : i64} {
  func.func @_asinh_kernel(%arg0: i32, %arg1: memref<2x1024xf32, #tpu.memory_space<vmem>>, %arg2: memref<2x1024xf32, #tpu.memory_space<vmem>>) attributes {dimension_semantics = [#tpu.dimension_semantics<parallel>], iteration_bounds = array<i64: 1>, scalar_prefetch = 0 : i64, scratch_operands = 0 : i64, tpu.core_type = #tpu.core_type<tc>, window_params = [{transform_indices = @transform_0, window_bounds = array<i64: 2, 1024>}, {transform_indices = @transform_1, window_bounds = array<i64: 2, 1024>}]} {
    %c0 = arith.constant 0 : index
    %c0_0 = arith.constant 0 : index
    %0 = vector.load %arg1[%c0, %c0_0] : memref<2x1024xf32, #tpu.memory_space<vmem>>, vector<2x1024xf32>
    %1 = math.absf %0 : vector<2x1024xf32>
    %cst = arith.constant 9.99999984E+17 : f32
    %2 = vector.broadcast %cst : f32 to vector<2x1024xf32>
    %3 = arith.cmpf ogt, %1, %2 : vector<2x1024xf32>
    %4 = arith.mulf %1, %1 : vector<2x1024xf32>
    %cst_1 = arith.constant 1.000000e+00 : f32
    %5 = vector.broadcast %cst_1 : f32 to vector<2x1024xf32>
    %6 = arith.addf %4, %5 : vector<2x1024xf32>
    %7 = math.sqrt %6 : vector<2x1024xf32>
    %cst_2 = arith.constant 1.000000e+00 : f32
    %8 = vector.broadcast %cst_2 : f32 to vector<2x1024xf32>
    %9 = arith.addf %8, %7 : vector<2x1024xf32>
    %10 = arith.divf %4, %9 : vector<2x1024xf32>
    %11 = arith.addf %1, %10 : vector<2x1024xf32>
    %12 = arith.select %3, %1, %11 : vector<2x1024xi1>, vector<2x1024xf32>
    %13 = math.log1p %12 : vector<2x1024xf32>
    %cst_3 = arith.constant 0.693147182 : f32
    %cst_4 = arith.constant 0.000000e+00 : f32
    %14 = vector.broadcast %cst_3 : f32 to vector<2x1024xf32>
    %15 = vector.broadcast %cst_4 : f32 to vector<2x1024xf32>
    %16 = arith.select %3, %14, %15 : vector<2x1024xi1>, vector<2x1024xf32>
    %17 = arith.addf %13, %16 : vector<2x1024xf32>
    %18 = tpu.bitcast %0 : vector<2x1024xf32> -> vector<2x1024xi32>
    %c31_i32 = arith.constant 31 : i32
    %19 = vector.broadcast %c31_i32 : i32 to vector<2x1024xi32>
    %20 = arith.shrsi %18, %19 : vector<2x1024xi32>
    %c0_i32 = arith.constant 0 : i32
    %21 = vector.broadcast %c0_i32 : i32 to vector<2x1024xi32>
    %22 = arith.cmpi ne, %20, %21 : vector<2x1024xi32>
    %cst_5 = arith.constant 0.000000e+00 : f32
    %23 = vector.broadcast %cst_5 : f32 to vector<2x1024xf32>
    %24 = arith.subf %23, %17 : vector<2x1024xf32>
    %25 = arith.select %22, %24, %17 : vector<2x1024xi1>, vector<2x1024xf32>
    %c0_6 = arith.constant 0 : index
    %c0_7 = arith.constant 0 : index
    %26 = vector.load %arg2[%c0_6, %c0_7] : memref<2x1024xf32, #tpu.memory_space<vmem>>, vector<2x1024xf32>
    tpu.vector_store %arg2[%c0_6, %c0_7], %25 {strides = array<i32>} : memref<2x1024xf32, #tpu.memory_space<vmem>>, vector<2x1024xf32>,
    return
  }
  func.func @transform_0(%arg0: i32) -> (i32, i32) {
    %c0_i32 = arith.constant 0 : i32
    %c0_i32_0 = arith.constant 0 : i32
    return %arg0, %c0_i32 : i32, i32
  }
  func.func @transform_1(%arg0: i32) -> (i32, i32) {
    %c0_i32 = arith.constant 0 : i32
    %c0_i32_0 = arith.constant 0 : i32
    return %arg0, %c0_i32 : i32, i32
  }
}

</mosaic_0001>

<bundles_post_ra>
// kernel: tpu_custom_call.1
= control target key start
LH: loop header
LB: loop body
LE: loop exit
PB: predicated region body
PF: predicated region fallthrough
CT: control target
= control target key end

     0   :  { %6 = vsyncpa [#allocation3], 0  ;;  %s394_s0 = inlined_call_operand.hbm [shape: f32[2,1024], index: 0, kind: input, shape index: {}]   ;;  %s395_s1 = inlined_call_operand.hbm [shape: f32[2,1024], index: 1, kind: output, shape index: {}]  }
   0x1   :  { %7 = vsyncpa [#allocation4], 0  ;;  %s13_s8 = sshll.u32 %s394_s0, 4  ;;  %s307_s9 = smov [#allocation2]   ;;  %s14_s8 = int_to_ptr.hbm [resolvable:$true] %s13_s8 }
   0x2   :  { %s15_s10 = sshll.u32 %s307_s9, 4  ;;  %s16_s10 = int_to_ptr.vmem [resolvable:$true] %s15_s10 }
   0x3   :  { %18 = dma.hbm_to_vmem [thread:$0]  %s14_s8, 256, %s16_s10, [#allocation3]  }
   0x4   :  { %303 = dma.done.wait [#allocation3], 256  }
   0x5   :  { %304 = vsyncadd [#allocation3], 4294967040  ;;  %v23_v0 = vld [vmem:[#allocation2] sm:$0xff]  ;;  %v24_v1 = vld [vmem:[#allocation2 + $0x8] sm:$0xff]  ;;  %s309_s0 = smov [#allocation5]   ;;  %s230_s14 = sshll.u32 %s395_s1, 4  ;;  %s231_s14 = int_to_ptr.hbm [resolvable:$true] %s230_s14 }
   0x6   :  { %v323_v2 = vand.u32 2147483647, %v23_v0  ;;  %117 = vst [vmem:[#allocation1] ss:$4 sm:$0xff] %v23_v0  ;;  %v325_v3 = vand.u32 2147483647, %v24_v1 }
   0x7   :  { %119 = vst [vmem:[#allocation1 + $0x20] ss:$4 sm:$0xff] %v24_v1  ;;  %s228_s11 = sshll.u32 %s309_s0, 4  ;;  %s229_s11 = int_to_ptr.vmem [resolvable:$true] %s228_s11 }
   0x8   :  { %v29_v4 = vmul.f32 %v323_v2, %v323_v2  ;;  %v331_v5 = vmul.f32 %v325_v3, %v325_v3  ;;  %vm27_vm12 = vcmp.gt.f32.partialorder %v323_v2, 1e+18  ;;  %vm28_vm13 = vcmp.gt.f32.partialorder %v325_v3, 1e+18 }
   0xa   :  { %v31_v6 = vadd.f32 1.0, %v29_v4  ;;  %v32_v7 = vadd.f32 1.0, %v331_v5 }
   0xc   :  { %243 = vrsqrt.f32 %v31_v6  ;;  %vm40_vm0 = vcmp.eq.f32.partialorder %v31_v6, inf  ;;  %v43_v19 = vand.u32 2147483648, %v31_v6  ;;  %vm42_vm1 = vcmp.eq.f32.partialorder %v31_v6, 0.0 }
   0xd   :  { %245 = vrsqrt.f32 %v32_v7  ;;  %vm52_vm2 = vcmp.eq.f32.partialorder %v32_v7, inf  ;;  %v55_v22 = vand.u32 2147483648, %v32_v7  ;;  %vm54_vm3 = vcmp.eq.f32.partialorder %v32_v7, 0.0 }
  0x12   :  { %v244_v8 = vpop.eup %243 }
  0x13   :  { %v246_v9 = vpop.eup %245  ;;  %v34_v10 = vmul.f32 %v244_v8, %v31_v6 }
  0x14   :  { %v46_v11 = vmul.f32 %v246_v9, %v32_v7 }
  0x15   :  { %v35_v12 = vmul.f32 %v244_v8, %v34_v10 }
  0x16   :  { %v47_v13 = vmul.f32 %v246_v9, %v46_v11 }
  0x17   :  { %v36_v14 = vmul.f32 0.5, %v35_v12  ;;  %v120_v12 = vld.sshfl [vmem:[#allocation1] sm:$0xff pattern:$0x73625140] }
  0x18   :  { %v48_v15 = vmul.f32 0.5, %v47_v13  ;;  %v121_v13 = vld.sshfl [vmem:[#allocation1 + $0x8] sm:$0xff pattern:$0x73625140] }
  0x19   :  { %v37_v16 = vsub.f32 1.5, %v36_v14  ;;  %v122_v14 = vld.sshfl [vmem:[#allocation1 + $0x10] sm:$0xff pattern:$0x73625140] }
  0x1a   :  { %v49_v17 = vsub.f32 1.5, %v48_v15 }
  0x1b   :  { %v38_v18 = vmul.f32 %v244_v8, %v37_v16 }
  0x1c   :  { %v50_v20 = vmul.f32 %v246_v9, %v49_v17  ;;  %v123_v17 = vld.sshfl [vmem:[#allocation1 + $0x18] sm:$0xff pattern:$0x73625140] }
  0x1d   :  { %v39_v21 = vmul.f32 %v38_v18, %v31_v6  ;;  %v124_v18 = vld.sshfl [vmem:[#allocation1 + $0x20] sm:$0xff pattern:$0x73625140] }
  0x1e   :  { %v51_v23 = vmul.f32 %v50_v20, %v32_v7  ;;  %v125_v20 = vld.sshfl [vmem:[#allocation1 + $0x28] sm:$0xff pattern:$0x73625140] }
  0x1f   :  { %v41_v24 = vsel %vm40_vm0, %v31_v6, %v39_v21  ;;  %v126_v21 = vld.sshfl [vmem:[#allocation1 + $0x30] sm:$0xff pattern:$0x73625140] }
  0x20   :  { %v44_v25 = vsel %vm42_vm1, %v43_v19, %v41_v24  ;;  %v53_v26 = vsel %vm52_vm2, %v32_v7, %v51_v23  ;;  %v308_v7 = vmov 0.0   ;;  %v127_v23 = vld.sshfl [vmem:[#allocation1 + $0x38] sm:$0xff pattern:$0x73625140]  ;;  %v128_v24 = vshra.s32 %v120_v12, 31 }
  0x21   :  { %v57_v27 = vadd.f32 1.0, %v44_v25  ;;  %v56_v28 = vsel %vm54_vm3, %v55_v22, %v53_v26  ;;  %v111_v8 = vsel %vm27_vm12, 0.6931472, %v308_v7  ;;  %v112_v10 = vsel %vm28_vm13, 0.6931472, %v308_v7 }
  0x22   :  { %v58_v29 = vadd.f32 1.0, %v56_v28  ;;  %v129_v25 = vshra.s32 %v121_v13, 31  ;;  %vm349_vm0 = vcmp.ne.s32.totalorder %v128_v24, 0 }
  0x23   :  { %247 = vrcp.f32 %v57_v27  ;;  %vm64_vm4 = vweird.f32 %v57_v27  ;;  %v70_v33 = vand.u32 2147483648, %v57_v27  ;;  %v68_v36 = vand.u32 2147483647, %v57_v27 }
  0x24   :  { %249 = vrcp.f32 %v58_v29  ;;  %v85_v37 = vand.u32 2147483648, %v58_v29  ;;  %vm79_vm6 = vweird.f32 %v58_v29  ;;  %v83_v39 = vand.u32 2147483647, %v58_v29 }
  0x25   :  { %v71_v41 = vor.u32 1.1754944e-38, %v70_v33  ;;  %vm69_vm9 = vcmp.eq.f32.partialorder %v68_v36, 8.507059e+37  ;;  %v133_v36 = vshra.s32 %v125_v20, 31  ;;  %vm137_vm1 = vcmp.ne.s32.totalorder %v129_v25, 0 }
  0x26   :  { %v86_v44 = vor.u32 1.1754944e-38, %v85_v37  ;;  %vm84_vm11 = vcmp.eq.f32.partialorder %v83_v39, 8.507059e+37  ;;  %v134_v37 = vshra.s32 %v126_v21, 31 }
  0x29   :  { %v248_v30 = vpop.eup %247 }
  0x2a   :  { %v250_v31 = vpop.eup %249  ;;  %v60_v32 = vmul.f32 %v248_v30, %v57_v27  ;;  %vm65_vm5 = vweird.f32 %v248_v30 }
  0x2b   :  { %v75_v34 = vmul.f32 %v250_v31, %v58_v29  ;;  %vm80_vm7 = vweird.f32 %v250_v31  ;;  %vm66_vm8 = vmor %vm64_vm4, %vm65_vm5  ;;  %vm210_vm4 = vcmask 1041408  }
  0x2c   :  { %v61_v35 = vsub.f32 1.0, %v60_v32  ;;  %vm81_vm10 = vmor %vm79_vm6, %vm80_vm7  ;;  %vm365_vm6 = vcmp.ne.s32.totalorder %v133_v36, 0  ;;  %vm369_vm7 = vcmp.ne.s32.totalorder %v134_v37, 0 }
  0x2d   :  { %v76_v38 = vsub.f32 1.0, %v75_v34 }
  0x2e   :  { %v62_v40 = vmul.f32 %v248_v30, %v61_v35  ;;  %v132_v35 = vshra.s32 %v124_v18, 31 }
  0x2f   :  { %v77_v42 = vmul.f32 %v250_v31, %v76_v38 }
  0x30   :  { %v63_v43 = vadd.f32 %v248_v30, %v62_v40  ;;  %vm361_vm5 = vcmp.ne.s32.totalorder %v132_v35, 0 }
  0x31   :  { %v78_v45 = vadd.f32 %v250_v31, %v77_v42 }
  0x32   :  { %v67_v46 = vsel %vm66_vm8, %v248_v30, %v63_v43  ;;  %vm212_vm8 = vcmask 1045508  }
  0x33   :  { %v72_v47 = vsel %vm69_vm9, %v71_v41, %v67_v46  ;;  %v82_v48 = vsel %vm81_vm10, %v250_v31, %v78_v45  ;;  %v131_v31 = vshra.s32 %v123_v17, 31  ;;  %v135_v41 = vshra.s32 %v127_v23, 31 }
  0x34   :  { %v73_v49 = vmul.f32 %v72_v47, %v29_v4  ;;  %v87_v50 = vsel %vm84_vm11, %v86_v44, %v82_v48  ;;  %vm214_vm9 = vcmask 1043456  }
  0x35   :  { %v88_v51 = vmul.f32 %v87_v50, %v331_v5  ;;  %vm357_vm3 = vcmp.ne.s32.totalorder %v131_v31, 0  ;;  %vm143_vm10 = vcmp.ne.s32.totalorder %v135_v41, 0 }
  0x36   :  { %v89_v52 = vadd.f32 %v73_v49, %v323_v2 }
  0x37   :  { %v90_v53 = vadd.f32 %v88_v51, %v325_v3 }
  0x38   :  { %v91_v54 = vsel %vm27_vm12, %v323_v2, %v89_v52 }
  0x39   :  { %v93_v55 = vadd.f32 1.0, %v91_v54  ;;  %v96_v56 = vmul.f32 -0.5, %v91_v54  ;;  %v92_v57 = vsel %vm28_vm13, %v325_v3, %v90_v53  ;;  %v99_v61 = vand.u32 2147483647, %v91_v54 }
  0x3a   :  { %v102_v58 = vadd.f32 1.0, %v92_v57  ;;  %v105_v59 = vmul.f32 -0.5, %v92_v57  ;;  %v108_v63 = vand.u32 2147483647, %v92_v57  ;;  %v130_v3 = vshra.s32 %v122_v14, 31 }
  0x3b   :  { %251 = vlog2.f32 %v93_v55  ;;  %v97_v60 = vadd.f32 1.0, %v96_v56  ;;  %vm100_vm14 = vcmp.lt.f32.partialorder %v99_v61, 0.0004427343 }
  0x3c   :  { %253 = vlog2.f32 %v102_v58  ;;  %v106_v62 = vadd.f32 1.0, %v105_v59  ;;  %vm109_vm15 = vcmp.lt.f32.partialorder %v108_v63, 0.0004427343  ;;  %vm353_vm2 = vcmp.ne.s32.totalorder %v130_v3, 0 }
  0x3d   :  { %v98_v0 = vmul.f32 %v97_v60, %v91_v54 }
  0x3e   :  { %v107_v4 = vmul.f32 %v106_v62, %v92_v57 }
  0x41   :  { %v252_v1 = vpop.eup %251 }
  0x42   :  { %v254_v5 = vpop.eup %253  ;;  %v95_v6 = vmul.f32 0.6931472, %v252_v1 }
  0x43   :  { %v104_v9 = vmul.f32 0.6931472, %v254_v5 }
  0x44   :  { %v101_v11 = vsel %vm100_vm14, %v98_v0, %v95_v6 }
  0x45   :  { %v113_v15 = vadd.f32 %v111_v8, %v101_v11  ;;  %v110_v16 = vsel %vm109_vm15, %v107_v4, %v104_v9 }
  0x46   :  { %v114_v19 = vadd.f32 %v112_v10, %v110_v16 }
  0x47   :  { %v144_v22 = vsub.f32 0.0, %v113_v15 }
  0x48   :  { %v145_v2 = vsub.f32 0.0, %v114_v19 }
  0x49   :  { %148 = vst [vmem:[#allocation1] ss:$4 sm:$0xff] %v144_v22 }
  0x4a   :  { %150 = vst [vmem:[#allocation1 + $0x20] ss:$4 sm:$0xff] %v145_v2 }
  0x50   :  { %v151_v26 = vld.sshfl [vmem:[#allocation1] sm:$0xff pattern:$0x73625140]  ;;  %v152_v27 = vld.sshfl [vmem:[#allocation1 + $0x8] sm:$0xff pattern:$0x73625140] }
  0x51   :  { %v153_v28 = vld.sshfl [vmem:[#allocation1 + $0x10] sm:$0xff pattern:$0x73625140]  ;;  %v154_v29 = vld.sshfl [vmem:[#allocation1 + $0x18] sm:$0xff pattern:$0x73625140] }
  0x52   :  { %169 = vst [vmem:[#allocation1] ss:$4 sm:$0xff] %v113_v15  ;;  %v155_v30 = vld.sshfl [vmem:[#allocation1 + $0x20] sm:$0xff pattern:$0x73625140] }
  0x53   :  { %v156_v32 = vld.sshfl [vmem:[#allocation1 + $0x28] sm:$0xff pattern:$0x73625140]  ;;  %v157_v33 = vld.sshfl [vmem:[#allocation1 + $0x30] sm:$0xff pattern:$0x73625140] }
  0x54   :  { %v158_v34 = vld.sshfl [vmem:[#allocation1 + $0x38] sm:$0xff pattern:$0x73625140] }
  0x55   :  { %171 = vst [vmem:[#allocation1 + $0x20] ss:$4 sm:$0xff] %v114_v19 }
  0x59   :  { %v172_v45 = vld.sshfl [vmem:[#allocation1] sm:$0xff pattern:$0x73625140]  ;;  %v173_v46 = vld.sshfl [vmem:[#allocation1 + $0x8] sm:$0xff pattern:$0x73625140] }
  0x5a   :  { %v174_v47 = vld.sshfl [vmem:[#allocation1 + $0x10] sm:$0xff pattern:$0x73625140]  ;;  %v175_v48 = vld.sshfl [vmem:[#allocation1 + $0x18] sm:$0xff pattern:$0x73625140]  ;;  %v189_v49 = vsel %vm137_vm1, %v152_v27, %v173_v46  ;;  %v188_v53 = vsel %vm349_vm0, %v151_v26, %v172_v45 }
  0x5b   :  { %v190_v50 = vsel %vm353_vm2, %v153_v28, %v174_v47  ;;  %v191_v51 = vsel %vm357_vm3, %v154_v29, %v175_v48  ;;  %v204_v52 = vrot.slane %v189_v49, 6 }
  0x5c   :  { %v205_v54 = vrot.slane %v190_v50, 4  ;;  %v206_v55 = vrot.slane %v191_v51, 2  ;;  %v176_v56 = vld.sshfl [vmem:[#allocation1 + $0x20] sm:$0xff pattern:$0x73625140] }
  0x5d   :  { %v211_v57 = vsel %vm210_vm4, %v188_v53, %v204_v52  ;;  %v177_v58 = vld.sshfl [vmem:[#allocation1 + $0x28] sm:$0xff pattern:$0x73625140]  ;;  %v178_v59 = vld.sshfl [vmem:[#allocation1 + $0x30] sm:$0xff pattern:$0x73625140]  ;;  %v192_v6 = vsel %vm361_vm5, %v155_v30, %v176_v56 }
  0x5e   :  { %v213_v60 = vsel %vm212_vm8, %v205_v54, %v206_v55  ;;  %v179_v61 = vld.sshfl [vmem:[#allocation1 + $0x38] sm:$0xff pattern:$0x73625140]  ;;  %v193_v62 = vsel %vm365_vm6, %v156_v32, %v177_v58  ;;  %v194_v63 = vsel %vm369_vm7, %v157_v33, %v178_v59 }
  0x5f   :  { %v215_v0 = vsel %vm214_vm9, %v211_v57, %v213_v60  ;;  %v195_v1 = vsel %vm143_vm10, %v158_v34, %v179_v61  ;;  %v207_v4 = vrot.slane %v193_v62, 6  ;;  %v208_v5 = vrot.slane %v194_v63, 4 }
  0x60   :  { %221 = vst [vmem:[#allocation5] sm:$0xff] %v215_v0  ;;  %v209_v7 = vrot.slane %v195_v1, 2 }
  0x61   :  { %v216_v8 = vsel %vm210_vm4, %v192_v6, %v207_v4 }
  0x62   :  { %v217_v9 = vsel %vm212_vm8, %v208_v5, %v209_v7 }
  0x63   :  { %v218_v10 = vsel %vm214_vm9, %v216_v8, %v217_v9 }
  0x64   :  { %222 = vst [vmem:[#allocation5 + $0x8] sm:$0xff] %v218_v10 }
  0x65   :  { %233 = dma.vmem_to_hbm [thread:$0]  %s229_s11, 256, %s231_s14, [#allocation4]  }
  0x66   :  { %305 = dma.done.wait [#allocation4], 256  }
  0x67   :  { %306 = vsyncadd [#allocation4], 4294967040 }
  0x68   :  { %238 = vsyncpa [#allocation3], 1 }
  0x69   :  { %239 = vsyncpa [#allocation4], 1 }

</bundles_post_ra>
